<compile_context>
chip_gen: v7x
topology: tpu7x:2x2x1
jax: 0.10.0
libtpu: 0.0.40
codegen_flags: <defaults>
</compile_context>

<pallas_src>
import functools

import jax
import jax.numpy as jnp
from jax import lax
from jax.experimental import pallas as pl
from jax.experimental.pallas import tpu as pltpu

_MiB = 1 << 20
_SUBLANE = {4: 8, 2: 16, 1: 32}  # min sublane multiple per itemsize


def _round_up(x: int, m: int) -> int:
    return ((x + m - 1) // m) * m


@functools.lru_cache(maxsize=None)
def _vmem_budget():
    """(tile budget, scoped vmem limit) derived from the running chip's VMEM."""
    cap = 64 * _MiB  # conservative default (v7x per-TC)
    try:
        info = pltpu.get_tpu_info()
        cap = int(getattr(info, "vmem_capacity_bytes", cap)) or cap
    except Exception:
        pass
    tile_budget = max(32 * _MiB, cap - 16 * _MiB)   # leave headroom for internal scratch
    vmem_limit = max(40 * _MiB, cap - 8 * _MiB)
    return tile_budget, vmem_limit


# ---------------------------------------------------------------------------
# Kernels
# ---------------------------------------------------------------------------
def _mm_resident_kernel(x_ref, q_ref, o_ref, *, precision):
    """One M-tile: o = x_tile @ Q.  Q is fully resident (single-buffered) in VMEM."""
    o_ref[...] = jnp.dot(
        x_ref[...], q_ref[...],
        preferred_element_type=jnp.float32,
        precision=precision,
    ).astype(o_ref.dtype)


def _mm_tiled_kernel(x_ref, q_ref, o_ref, *scratch, precision, accumulate_in_out):
    """3-D (M, N, K) tiled matmul for Q too large to stay resident."""
    acc_ref = o_ref if accumulate_in_out else scratch[0]

    @pl.when(pl.program_id(2) == 0)
    def _():
        acc_ref[...] = jnp.zeros_like(acc_ref)

    acc_ref[...] += jnp.dot(
        x_ref[...], q_ref[...],
        preferred_element_type=jnp.float32,
        precision=precision,
    )

    if not accumulate_in_out:
        @pl.when(pl.program_id(2) == pl.num_programs(2) - 1)
        def _():
            o_ref[...] = acc_ref[...].astype(o_ref.dtype)


# ---------------------------------------------------------------------------
# Pallas wrapper
# ---------------------------------------------------------------------------
def _pallas_matmul(x2d, q_pad, S, *, compute_dtype, out_dtype, precision):
    """x2d: (M, S); q_pad: (Sp, Sp) already cast & zero-padded -> (M, S) = x @ q."""
    M = x2d.shape[0]
    Sp = q_pad.shape[0]
    bytes_per = jnp.dtype(compute_dtype).itemsize
    sub = _SUBLANE.get(bytes_per, 8)
    m_pad_min = _round_up(max(M, sub), sub)
    tile_budget, vmem_limit = _vmem_budget()

    x_in = x2d.astype(compute_dtype)

    # ---- Resident-Q path: grid over M only; Q single-buffered in VMEM -----------
    q_bytes = Sp * Sp * bytes_per                      # counted once: pl.Buffered(1)
    avail = tile_budget - q_bytes
    tm_fit = 0
    if avail > 0:
        tm_fit = (avail // (4 * Sp * bytes_per)) // sub * sub   # x + out double-buffered

    if tm_fit >= min(512, m_pad_min):
        tm = min(tm_fit, 4096, m_pad_min)
        Mp = _round_up(M, tm)
        if Mp != M or Sp != S:                          # pad only when actually needed
            x_in = jnp.pad(x_in, ((0, Mp - M), (0, Sp - S)))

        kernel = functools.partial(_mm_resident_kernel, precision=precision)
        out = pl.pallas_call(
            kernel,
            out_shape=jax.ShapeDtypeStruct((Mp, Sp), out_dtype),
            grid_spec=pltpu.PrefetchScalarGridSpec(
                num_scalar_prefetch=0,
                grid=(Mp // tm,),
                in_specs=[
                    pl.BlockSpec((tm, Sp), lambda i: (i, 0)),
                    # Constant block -> keep a single copy resident across the grid.
                    pl.BlockSpec((Sp, Sp), lambda i: (0, 0),
                                 pipeline_mode=pl.Buffered(1)),
                ],
                out_specs=pl.BlockSpec((tm, Sp), lambda i: (i, 0)),
            ),
            compiler_params=pltpu.CompilerParams(
                dimension_semantics=("parallel",),
                vmem_limit_bytes=vmem_limit,
            ),
            cost_estimate=pl.CostEstimate(
                flops=2 * Mp * Sp * Sp,
                bytes_accessed=bytes_per * (2 * Mp * Sp + Sp * Sp),
                transcendentals=0,
            ),
        )(x_in, q_pad)
        if Mp != M or Sp != S:
            out = out[:M, :S]
        return out

    # ---- Large-Q path: Q streamed in (ts, ts) tiles, 3-D (M, N, K) grid ----------
    ts = 512 if Sp % 512 == 0 else (256 if Sp % 256 == 0 else 128)
    tm = min(512, m_pad_min)
    Mp = _round_up(M, tm)
    if Mp != M or Sp != S:
        x_in = jnp.pad(x_in, ((0, Mp - M), (0, Sp - S)))

    accumulate_in_out = jnp.dtype(out_dtype) == jnp.float32
    kernel = functools.partial(_mm_tiled_kernel, precision=precision,
                               accumulate_in_out=accumulate_in_out)
    scratch = [] if accumulate_in_out else [pltpu.VMEM((tm, ts), jnp.float32)]

    out = pl.pallas_call(
        kernel,
        out_shape=jax.ShapeDtypeStruct((Mp, Sp), out_dtype),
        grid_spec=pltpu.PrefetchScalarGridSpec(
            num_scalar_prefetch=0,
            grid=(Mp // tm, Sp // ts, Sp // ts),
            in_specs=[
                pl.BlockSpec((tm, ts), lambda i, j, k: (i, k),
                             pipeline_mode=pl.Buffered(3)),
                pl.BlockSpec((ts, ts), lambda i, j, k: (k, j),
                             pipeline_mode=pl.Buffered(3)),
            ],
            out_specs=pl.BlockSpec((tm, ts), lambda i, j, k: (i, j)),
            scratch_shapes=scratch,
        ),
        compiler_params=pltpu.CompilerParams(
            dimension_semantics=("parallel", "parallel", "arbitrary"),
            vmem_limit_bytes=vmem_limit,
        ),
        cost_estimate=pl.CostEstimate(
            flops=2 * Mp * Sp * Sp,
            bytes_accessed=bytes_per * (2 * Mp * Sp + Sp * Sp),
            transcendentals=0,
        ),
    )(x_in, q_pad)
    if Mp != M or Sp != S:
        out = out[:M, :S]
    return out


# ---------------------------------------------------------------------------
# ParametrisedOrthogonalMatrix equivalent
# ---------------------------------------------------------------------------
class ParametrisedOrthogonalMatrix:
    """JAX/Pallas port of the PyTorch module.

    Q = expm(tril(A,-1) - tril(A,-1)^T), mirroring PyTorch's
    orthogonal(..., orthogonal_map="matrix_exp") default for square real matrices.
    forward(x) = x @ Q, inverse(x) = x @ Q.T.

    `compute_dtype=jnp.bfloat16` is an opt-in fast path (MXU-native, f32 accumulate);
    default stays f32 for fidelity.  Call `invalidate_cache()` if `A` is updated.
    """

    def __init__(self, size: int, key: jax.Array,
                 compute_dtype=jnp.float32, force_pallas: bool = False):
        self.size = size
        self.compute_dtype = jnp.dtype(compute_dtype)
        self.force_pallas = force_pallas
        bound = 1.0 / (size ** 0.5)
        # Deterministic synthetic init (nn.Linear-style scale).
        self.A = jax.random.uniform(key, (size, size), jnp.float32,
                                    minval=-bound, maxval=bound)
        self._cache = None  # (Q, padded Q, padded Q.T) -- computed once, kernel-ready

    def invalidate_cache(self):
        self._cache = None

    def _materialise(self):
        if self._cache is None:
            lower = jnp.tril(self.A, k=-1)
            skew = lower - lower.T                       # skew-symmetric
            q = jax.scipy.linalg.expm(skew)              # orthogonal by construction
            Sp = _round_up(self.size, 128)
            pad = Sp - self.size
            qc = q.astype(self.compute_dtype)
            q_fwd = jnp.pad(qc, ((0, pad), (0, pad))) if pad else qc
            q_inv = jnp.pad(qc.T, ((0, pad), (0, pad))) if pad else qc.T
            self._cache = (q, q_fwd, q_inv)
        return self._cache

    def get_orthogonal_matrix(self) -> jax.Array:
        return self._materialise()[0]

    def _precision(self):
        return (lax.Precision.HIGHEST if self.compute_dtype == jnp.float32
                else lax.Precision.DEFAULT)

    def _apply(self, x: jax.Array, inverse: bool) -> jax.Array:
        q, q_fwd, q_inv = self._materialise()
        S = self.size
        lead = x.shape[:-1]
        x2d = x.reshape((-1, S))
        M = x2d.shape[0]
        out_dtype = x.dtype
        precision = self._precision()

        # Small-problem fallback: padding + launch overhead dominate -> plain XLA dot.
        use_pallas = self.force_pallas or (
            S >= 128 and M >= 64 and 2 * M * S * S >= (1 << 22))
        if not use_pallas:
            qm = q.T if inverse else q
            out = jnp.dot(x2d.astype(self.compute_dtype),
                          qm.astype(self.compute_dtype),
                          preferred_element_type=jnp.float32,
                          precision=precision).astype(out_dtype)
        else:
            q_pad = q_inv if inverse else q_fwd   # cached pre-transposed Q: no in-kernel relayout
            out = _pallas_matmul(x2d, q_pad, S,
                                 compute_dtype=self.compute_dtype,
                                 out_dtype=out_dtype, precision=precision)
        return out.reshape(lead + (S,))

    def forward(self, x: jax.Array) -> jax.Array:
        return self._apply(x, inverse=False)

    def inverse(self, x: jax.Array) -> jax.Array:
        return self._apply(x, inverse=True)

    __call__ = forward


if __name__ == "__main__":
    key = jax.random.PRNGKey(0)
    k_param, k_x, k_param2, k_x2 = jax.random.split(key, 4)

    # --- Small shape consistent with the module (takes the XLA small-problem path) ---
    size, batch = 32, 8
    module = ParametrisedOrthogonalMatrix(size, k_param)
    x = jax.random.normal(k_x, (batch, size), jnp.float32)

    out = jax.block_until_ready(module(x))
    q = module.get_orthogonal_matrix()
    assert out.shape == (batch, size)
    assert jnp.allclose(out, x @ q, atol=1e-5, rtol=1e-5)
    assert jnp.allclose(q @ q.T, jnp.eye(size), atol=1e-4)
    inv = jax.block_until_ready(module.inverse(out))
    assert jnp.allclose(inv, x, atol=1e-4)

    # --- Lane-aligned case that exercises the Pallas resident-Q kernel (fwd + inverse
    #     via the cached pre-transposed Q) ---
    size2, batch2 = 128, 256
    module2 = ParametrisedOrthogonalMatrix(size2, k_param2, force_pallas=True)
    x2 = jax.random.normal(k_x2, (batch2, size2), jnp.float32)

    out2 = jax.block_until_ready(module2(x2))
    q2 = module2.get_orthogonal_matrix()
    ref2 = jnp.dot(x2, q2, precision=lax.Precision.HIGHEST)
    assert out2.shape == (batch2, size2)
    assert jnp.allclose(out2, ref2, atol=1e-4, rtol=1e-4)
    inv2 = jax.block_until_ready(module2.inverse(out2))
    assert jnp.allclose(inv2, x2, atol=1e-3)

    print("KERNEL_OK")
</pallas_src>

<mosaic_0001>
module attributes {stable_mosaic.version = 11 : i64} {
  func.func @_mm_resident_kernel(%arg0: i32, %arg1: memref<256x128xf32, #tpu.memory_space<vmem>>, %arg2: memref<128x128xf32, #tpu.memory_space<vmem>>, %arg3: memref<256x128xf32, #tpu.memory_space<vmem>>) attributes {dimension_semantics = [#tpu.dimension_semantics<parallel>], iteration_bounds = array<i64: 1>, scalar_prefetch = 0 : i64, scratch_operands = 0 : i64, tpu.core_type = #tpu.core_type<tc>, window_params = [{transform_indices = @transform_0, window_bounds = array<i64: 256, 128>}, {pipeline_mode = #tpu.pipeline_mode<synchronous>, transform_indices = @transform_1, window_bounds = array<i64: 128, 128>}, {transform_indices = @transform_2, window_bounds = array<i64: 256, 128>}]} {
    %c0 = arith.constant 0 : index
    %c0_0 = arith.constant 0 : index
    %0 = vector.load %arg1[%c0, %c0_0] : memref<256x128xf32, #tpu.memory_space<vmem>>, vector<256x128xf32>
    %c0_1 = arith.constant 0 : index
    %c0_2 = arith.constant 0 : index
    %1 = vector.load %arg2[%c0_1, %c0_2] : memref<128x128xf32, #tpu.memory_space<vmem>>, vector<128x128xf32>
    %cst = arith.constant dense<0.000000e+00> : vector<256x128xf32>
    %2 = tpu.matmul %0, %1, %cst {dimension_numbers = #tpu.dot_dimension_numbers<[1], [0], [0], [1], [0, 0, 1, 1], [], []>, precision = #tpu.contract_precision<fp32>} : vector<256x128xf32>, vector<128x128xf32>, vector<256x128xf32> -> vector<256x128xf32>
    %c0_3 = arith.constant 0 : index
    %c0_4 = arith.constant 0 : index
    %3 = vector.load %arg3[%c0_3, %c0_4] : memref<256x128xf32, #tpu.memory_space<vmem>>, vector<256x128xf32>
    tpu.vector_store %arg3[%c0_3, %c0_4], %2 {strides = array<i32>} : memref<256x128xf32, #tpu.memory_space<vmem>>, vector<256x128xf32>,
    return
  }
  func.func @transform_0(%arg0: i32) -> (i32, i32) {
    %c0_i32 = arith.constant 0 : i32
    %c0_i32_0 = arith.constant 0 : i32
    return %arg0, %c0_i32 : i32, i32
  }
  func.func @transform_1(%arg0: i32) -> (i32, i32) {
    %c0_i32 = arith.constant 0 : i32
    %c0_i32_0 = arith.constant 0 : i32
    %c0_i32_1 = arith.constant 0 : i32
    return %c0_i32, %c0_i32_0 : i32, i32
  }
  func.func @transform_2(%arg0: i32) -> (i32, i32) {
    %c0_i32 = arith.constant 0 : i32
    %c0_i32_0 = arith.constant 0 : i32
    return %arg0, %c0_i32 : i32, i32
  }
}

</mosaic_0001>

<bundles_post_ra>
// kernel: tpu_custom_call.1
= control target key start
LH: loop header
LB: loop body
LE: loop exit
PB: predicated region body
PF: predicated region fallthrough
CT: control target
= control target key end

     0   :  { %7 = vsyncpa [#allocation3], 0  ;;  %s4142_s0 = inlined_call_operand.hbm [shape: f32[256,128], index: 0, kind: input, shape index: {}]   ;;  %s4143_s1 = inlined_call_operand.hbm [shape: f32[128,128], index: 1, kind: input, shape index: {}]   ;;  %s4144_s2 = inlined_call_operand.hbm [shape: f32[256,128], index: 2, kind: output, shape index: {}]  }
   0x1   :  { %8 = vsyncpa [#allocation6], 0 }
   0x2   :  { %9 = vsyncpa [#allocation4], 0  ;;  %s3309_s9 = smov [#allocation2]   ;;  %s3237_s13 = scalar_lea.hbm %s4142_s0, 4096 }
   0x3   :  { %s15_s10 = sshll.u32 %s3309_s9, 4  ;;  %p3238_p0 = scmp.ne.s32.totalorder %s4142_s0, %s3237_s13  ;;  %s16_s10 = int_to_ptr.vmem [resolvable:$true] %s15_s10 }
   0x4   :  { %p3241_p1 = scmp.lt.u32.totalorder %s3237_s13, %s4142_s0 }
   0x6   :  { %p3243_p2 = pnand %p3241_p1, %p3238_p0 }
   0x8   :  { %3246 = shalt.err (!%p3243_p2)
}
   0x9   :  { %s3247_s18 = scalar_lea.vmem %s16_s10, 4096  ;;  %p3252_p4 = scmp.lt.s32.totalorder %s16_s10, %s16_s10 }
   0xa   :  { %p3248_p3 = scmp.ne.s32.totalorder %s16_s10, %s3247_s18  ;;  %p3253_p5 = scmp.lt.s32.totalorder %s3247_s18, %s3247_s18 }
   0xc   :  { %p3254_p6 = por %p3253_p5, %p3252_p4 }
   0xe   :  { %p3255_p7 = pnand %p3254_p6, %p3248_p3 }
  0x10   :  { %3258 = shalt.err (!%p3255_p7)
}
  0x11   :  { %s3310_s19 = smov 128   ;;  %s3311_s20 = smov 8  }
  0x12   :  { %21 = dma.hbm_to_vmem [thread:$0]  %s4142_s0, 4096, %s16_s10, [#allocation3], %s3310_s19, %s3310_s19, %s3311_s20  }
  0x13   :  { %s3312_s23 = smov [#allocation5]   ;;  %s3259_s27 = scalar_lea.hbm %s4143_s1, 2048 }
  0x14   :  { %s27_s24 = sshll.u32 %s3312_s23, 4  ;;  %p3260_p8 = scmp.ne.s32.totalorder %s4143_s1, %s3259_s27  ;;  %s28_s24 = int_to_ptr.vmem [resolvable:$true] %s27_s24 }
  0x15   :  { %p3263_p9 = scmp.lt.u32.totalorder %s3259_s27, %s4143_s1 }
  0x17   :  { %p3265_p10 = pnand %p3263_p9, %p3260_p8 }
  0x19   :  { %3268 = shalt.err (!%p3265_p10)
}
  0x1a   :  { %s3269_s4 = scalar_lea.vmem %s28_s24, 2048  ;;  %p3274_p12 = scmp.lt.s32.totalorder %s28_s24, %s28_s24 }
  0x1b   :  { %p3270_p11 = scmp.ne.s32.totalorder %s28_s24, %s3269_s4  ;;  %p3275_p13 = scmp.lt.s32.totalorder %s3269_s4, %s3269_s4 }
  0x1d   :  { %p3276_p0 = por %p3275_p13, %p3274_p12 }
  0x1f   :  { %p3277_p1 = pnand %p3276_p0, %p3270_p11 }
  0x21   :  { %3280 = shalt.err (!%p3277_p1)
}
  0x22   :  { %33 = dma.hbm_to_vmem [thread:$0]  %s4143_s1, 2048, %s28_s24, [#allocation6], %s3310_s19, %s3310_s19, %s3311_s20  }
  0x23   :  { %3303 = dma.done.wait [#allocation3], 4096  }
  0x24   :  { %3304 = vsyncadd [#allocation3], 4294963200 }
  0x25   :  { %3305 = dma.done.wait [#allocation6], 2048  }
  0x26   :  { %3306 = vsyncadd [#allocation6], 4294965248  ;;  %v72_v0 = vld [vmem:[#allocation5] sm:$0xff]  ;;  %v73_v1 = vld [vmem:[#allocation5 + $0x8] sm:$0xff]  ;;  %s3313_s1 = smov [#allocation7]  }
  0x27   :  { %v3359_v2 = vld [vmem:[#allocation5 + $0x10] sm:$0xff]  ;;  %v89_v3 = vand.u32 4294901760, %v72_v0  ;;  %v92_v4 = vand.u32 4294901760, %v73_v1  ;;  %v3361_v5 = vld [vmem:[#allocation5 + $0x18] sm:$0xff]  ;;  %v3364_v7 = vld [vmem:[#allocation5 + $0x20] sm:$0xff]  ;;  %s2099_s6 = sshll.u32 %s3313_s1, 4  ;;  %s2100_s6 = int_to_ptr.vmem [resolvable:$true] %s2099_s6 }
  0x28   :  { %v95_v6 = vand.u32 4294901760, %v3359_v2  ;;  %v3366_v8 = vld [vmem:[#allocation5 + $0x28] sm:$0xff]  ;;  %v98_v9 = vand.u32 4294901760, %v3361_v5  ;;  %v101_v11 = vand.u32 4294901760, %v3364_v7  ;;  %v3379_v14 = vld [vmem:[#allocation5 + $0x30] sm:$0xff]  ;;  %v3381_v15 = vld [vmem:[#allocation5 + $0x38] sm:$0xff]  ;;  %p3286_p3 = scmp.lt.s32.totalorder %s2100_s6, %s2100_s6 }
  0x29   :  { %v3369_v10 = vpack.c.bf16 %v92_v4, %v89_v3  ;;  %v104_v12 = vand.u32 4294901760, %v3366_v8  ;;  %v40_v16 = vld [vmem:[#allocation2] sm:$0xff]  ;;  %v107_v19 = vand.u32 4294901760, %v3379_v14  ;;  %v110_v20 = vand.u32 4294901760, %v3381_v15  ;;  %v3401_v22 = vld [vmem:[#allocation5 + $0x48] sm:$0xff]  ;;  %v3419_v29 = vld [vmem:[#allocation5 + $0x50] sm:$0xff] }
  0x2a   :  { %v3377_v13 = vpack.c.bf16 %v98_v9, %v95_v6  ;;  %v3387_v17 = vand.u32 4294901760, %v40_v16  ;;  %v3399_v21 = vld [vmem:[#allocation5 + $0x40] sm:$0xff]  ;;  %v41_v25 = vld [vmem:[#allocation2 + $0x8] sm:$0xff]  ;;  %v4152_v28 = vand.u32 4294901760, %v3401_v22  ;;  %v3421_v30 = vld [vmem:[#allocation5 + $0x58] sm:$0xff]  ;;  %v4150_v35 = vand.u32 4294901760, %v3419_v29 }
  0x2b   :  { %2881 = vmatprep.subr.bf16.mxu1 %v3369_v10  ;;  %2977 = vmatprep.subr.bf16.mxu0 %v3369_v10  ;;  %v3395_v18 = vpack.c.bf16 %v104_v12, %v101_v11  ;;  %v3415_v26 = vpack.c.bf16 %v110_v20, %v107_v19  ;;  %v4153_v27 = vand.u32 4294901760, %v3399_v21  ;;  %v42_v32 = vld [vmem:[#allocation2 + $0x10] sm:$0xff]  ;;  %v3424_v33 = vand.u32 4294901760, %v41_v25  ;;  %v43_v34 = vld [vmem:[#allocation2 + $0x18] sm:$0xff]  ;;  %v3430_v37 = vld [vmem:[#allocation5 + $0x60] sm:$0xff]  ;;  %s3281_s7 = scalar_lea.vmem %s2100_s6, 4096 }
  0x2c   :  { %2883 = vmatpush3.bf16.msra.mxu1 %v3369_v10  ;;  %2979 = vmatpush3.bf16.msra.mxu0 %v3369_v10  ;;  %v3404_v23 = vsub.f32 %v40_v16, %v3387_v17  ;;  %v4149_v36 = vand.u32 4294901760, %v3421_v30  ;;  %v3432_v39 = vsub.f32 %v72_v0, %v89_v3  ;;  %v3442_v41 = vld [vmem:[#allocation5 + $0x68] sm:$0xff]  ;;  %v3444_v42 = vsub.f32 %v73_v1, %v92_v4  ;;  %v44_v44 = vld [vmem:[#allocation2 + $0x20] sm:$0xff]  ;;  %v3451_v47 = vld [vmem:[#allocation5 + $0x70] sm:$0xff]  ;;  %p3282_p2 = scmp.ne.s32.totalorder %s2100_s6, %s3281_s7  ;;  %p3287_p4 = scmp.lt.s32.totalorder %s3281_s7, %s3281_s7 }
  0x2d   :  { %2885 = vmatprep.subr.bf16.mxu1 %v3377_v13  ;;  %2981 = vmatprep.subr.bf16.mxu0 %v3377_v13  ;;  %4209 = vst [vmem:[#allocation11_spill] sm:$0xff] %v3395_v18  ;;  %4211 = vst [vmem:[#allocation13_spill] sm:$0xff] %v3415_v26  ;;  %v3440_v40 = vpack.c.bf16 %v4152_v28, %v4153_v27  ;;  %v3446_v43 = vand.u32 4294901760, %v42_v32  ;;  %v3448_v45 = vand.u32 4294901760, %v43_v34  ;;  %v4148_v46 = vand.u32 4294901760, %v3430_v37  ;;  %v3453_v48 = vld [vmem:[#allocation5 + $0x78] sm:$0xff] }
  0x2e   :  { %4210 = vst [vmem:[#allocation12_spill] sm:$0xff] %v3404_v23  ;;  %v171_v24 = vand.u32 4294901760, %v3404_v23  ;;  %v3456_v49 = vsub.f32 %v41_v25, %v3424_v33  ;;  %v3464_v50 = vpack.c.bf16 %v4149_v36, %v4150_v35  ;;  %v4147_v51 = vand.u32 4294901760, %v3442_v41  ;;  %v45_v56 = vld [vmem:[#allocation2 + $0x28] sm:$0xff]  ;;  %v46_v3 = vld [vmem:[#allocation2 + $0x30] sm:$0xff]  ;;  %v47_v4 = vld [vmem:[#allocation2 + $0x38] sm:$0xff]  ;;  %p3288_p5 = por %p3287_p4, %p3286_p3 }
  0x2f   :  { %4212 = vst [vmem:[#allocation14_spill] sm:$0xff] %v3440_v40  ;;  %v492_v52 = vand.u32 4294901760, %v3432_v39  ;;  %v3468_v53 = vand.u32 4294901760, %v44_v44  ;;  %v499_v54 = vand.u32 4294901760, %v3444_v42  ;;  %v3474_v55 = vsub.f32 %v42_v32, %v3446_v43 }
  0x30   :  { %2887 = vmatpush3.bf16.msra.mxu1 %v3377_v13  ;;  %2983 = vmatpush3.bf16.msra.mxu0 %v3377_v13  ;;  %v172_v31 = vsub.f32 %v3404_v23, %v171_v24  ;;  %4213 = vst [vmem:[#allocation15_spill] sm:$0xff] %v3456_v49  ;;  %4214 = vst [vmem:[#allocation16_spill] sm:$0xff] %v3464_v50  ;;  %v3479_v57 = vsub.f32 %v3359_v2, %v95_v6  ;;  %v4146_v59 = vand.u32 4294901760, %v3451_v47  ;;  %v51_v23 = vld [vmem:[#allocation2 + $0x58] sm:$0xff]  ;;  %p3289_p6 = pnand %p3288_p5, %p3282_p2 }
  0x31   :  { %2889 = vmatprep.subr.bf16.mxu1 %v3395_v18  ;;  %2985 = vmatprep.subr.bf16.mxu0 %v3395_v18  ;;  %4215 = vst [vmem:[#allocation17_spill] sm:$0xff] %v3474_v55  ;;  %v3484_v58 = vsub.f32 %v3361_v5, %v98_v9  ;;  %v4145_v60 = vand.u32 4294901760, %v3453_v48  ;;  %v3489_v61 = vsub.f32 %v43_v34, %v3448_v45  ;;  %v4155_v62 = vand.u32 4294901760, %v3456_v49 }
  0x32   :  { %2672 = vmatprep.mubr.f32.mxu0 %v171_v24  ;;  %v173_v38 = vand.u32 4294901760, %v172_v31  ;;  %v3498_v63 = vpack.c.bf16 %v4147_v51, %v4148_v46  ;;  %v493_v0 = vsub.f32 %v3432_v39, %v492_v52  ;;  %v3502_v1 = vsub.f32 %v44_v44, %v3468_v53  ;;  %v48_v24 = vld [vmem:[#allocation2 + $0x40] sm:$0xff]  ;;  %v49_v51 = vld [vmem:[#allocation2 + $0x48] sm:$0xff] }
  0x33   :  { %4216 = vst [vmem:[#allocation18_spill] sm:$0xff] %v3489_v61  ;;  %v3504_v2 = vand.u32 4294901760, %v45_v56  ;;  %v500_v5 = vsub.f32 %v3444_v42, %v499_v54  ;;  %v4151_v6 = vand.u32 4294901760, %v3474_v55  ;;  %v4157_v9 = vand.u32 4294901760, %v3479_v57 }
  0x34   :  { %2891 = vmatpush3.bf16.msra.mxu1 %v3395_v18  ;;  %2987 = vmatpush3.bf16.msra.mxu0 %v3395_v18  ;;  %4217 = vst [vmem:[#allocation19_spill] sm:$0xff] %v3498_v63  ;;  %4218 = vst [vmem:[#allocation20_spill] sm:$0xff] %v3502_v1  ;;  %v4156_v16 = vand.u32 4294901760, %v3484_v58  ;;  %v3516_v25 = vpack.c.bf16 %v4145_v60, %v4146_v59  ;;  %v4154_v31 = vand.u32 4294901760, %v3489_v61  ;;  %v3536_v60 = vand.u32 4294901760, %v46_v3 }
  0x35   :  { %2893 = vmatprep.subr.bf16.mxu1 %v3415_v26  ;;  %2989 = vmatprep.subr.bf16.mxu0 %v3415_v26  ;;  %4219 = vst [vmem:[#allocation21_spill] sm:$0xff] %v3504_v2  ;;  %v3522_v32 = vsub.f32 %v3364_v7, %v101_v11  ;;  %v3527_v34 = vsub.f32 %v3366_v8, %v104_v12  ;;  %v3538_v59 = vand.u32 4294901760, %v47_v4  ;;  %v494_v7 = vand.u32 4294901760, %v493_v0 }
  0x36   :  { %2432 = vmatprep.mubr.f32.mxu1 %v173_v38  ;;  %4220 = vst [vmem:[#allocation22_spill] sm:$0xff] %v3516_v25  ;;  %v3532_v38 = vsub.f32 %v3456_v49, %v4155_v62  ;;  %v3534_v44 = vpack.c.bf16 %v499_v54, %v492_v52  ;;  %4221 = vst [vmem:[#allocation23_spill] sm:$0xff] %v3536_v60  ;;  %v4158_v11 = vand.u32 4294901760, %v3502_v1  ;;  %v3546_v12 = vand.u32 4294901760, %v48_v24 }
  0x37   :  { %4222 = vst [vmem:[#allocation24_spill] sm:$0xff] %v3538_v59  ;;  %v3544_v8 = vsub.f32 %v45_v56, %v3504_v2  ;;  %v501_v52 = vand.u32 4294901760, %v500_v5  ;;  %v3553_v54 = vsub.f32 %v3474_v55, %v4151_v6  ;;  %v507_v0 = vsub.f32 %v3479_v57, %v4157_v9 }
  0x38   :  { %2895 = vmatpush3.bf16.msra.mxu1 %v3415_v26  ;;  %2991 = vmatpush3.bf16.msra.mxu0 %v3415_v26  ;;  %4224 = vst [vmem:[#allocation26_spill] sm:$0xff] %v3546_v12  ;;  %v514_v56 = vsub.f32 %v3484_v58, %v4156_v16  ;;  %v3564_v46 = vsub.f32 %v3489_v61, %v4154_v31  ;;  %v520_v5 = vand.u32 4294901760, %v3522_v32  ;;  %v527_v36 = vand.u32 4294901760, %v3527_v34 }
  0x39   :  { %2897 = vmatprep.subr.bf16.mxu1 %v3440_v40  ;;  %2993 = vmatprep.subr.bf16.mxu0 %v3440_v40  ;;  %4223 = vst [vmem:[#allocation25_spill] sm:$0xff] %v3544_v8  ;;  %v3571_v35 = vsub.f32 %v3379_v14, %v107_v19  ;;  %v3574_v6 = vsub.f32 %v46_v3, %v3536_v60  ;;  %v3579_v27 = vand.u32 4294901760, %v49_v51  ;;  %v183_v14 = vand.u32 4294901760, %v3532_v38  ;;  %v50_v38 = vld [vmem:[#allocation2 + $0x50] sm:$0xff] }
  0x3a   :  { %v3577_v28 = vsub.f32 %v47_v4, %v3538_v59  ;;  %v3584_v31 = vsub.f32 %v3381_v15, %v110_v20  ;;  %v3592_v19 = vsub.f32 %v3502_v1, %v4158_v11  ;;  %v3596_v4 = vsub.f32 %v48_v24, %v3546_v12 }
  0x3b   :  { %4225 = vst [vmem:[#allocation27_spill] sm:$0xff] %v3574_v6  ;;  %4227 = vst [vmem:[#allocation29_spill] sm:$0xff] %v3579_v27  ;;  %v2912_v15 = vpack.c.bf16 %v501_v52, %v494_v7  ;;  %v193_v20 = vand.u32 4294901760, %v3553_v54  ;;  %v508_v62 = vand.u32 4294901760, %v507_v0  ;;  %v515_v16 = vand.u32 4294901760, %v514_v56 }
  0x3c   :  { %2899 = vmatpush3.bf16.msra.mxu1 %v3440_v40  ;;  %2995 = vmatpush3.bf16.msra.mxu0 %v3440_v40  ;;  %4226 = vst [vmem:[#allocation28_spill] sm:$0xff] %v3577_v28  ;;  %4228 = vst [vmem:[#allocation30_spill] sm:$0xff] %v3596_v4  ;;  %v521_v9 = vsub.f32 %v3522_v32, %v520_v5  ;;  %v528_v11 = vsub.f32 %v3527_v34, %v527_v36  ;;  %v213_v54 = vand.u32 4294901760, %v3592_v19 }
  0x3d   :  { %2901 = vmatprep.subr.bf16.mxu1 %v3464_v50  ;;  %2997 = vmatprep.subr.bf16.mxu0 %v3464_v50  ;;  %v3609_v52 = vsub.f32 %v49_v51, %v3579_v27  ;;  %v4230_v0 = vand.u32 4294901760, %v3544_v8  ;;  %v3620_v24 = vand.u32 4294901760, %v50_v38  ;;  %v2916_v51 = vpack.c.bf16 %v515_v16, %v508_v62  ;;  %v53_v27 = vld [vmem:[#allocation2 + $0x68] sm:$0xff] }
  0x3e   :  { %v4232_v7 = vand.u32 4294901760, %v3479_v57  ;;  %v4233_v40 = vand.u32 4294901760, %v3484_v58  ;;  %v529_v12 = vand.u32 4294901760, %v528_v11  ;;  %v4235_v26 = vand.u32 4294901760, %v3584_v31 }
  0x3f   :  { %4229 = vst [vmem:[#allocation31_spill] sm:$0xff] %v3609_v52  ;;  %v3617_v56 = vsub.f32 %v3544_v8, %v4230_v0  ;;  %4231 = vst [vmem:[#allocation32_spill] sm:$0xff] %v3620_v24  ;;  %v522_v0 = vand.u32 4294901760, %v521_v9  ;;  %v4236_v16 = vand.u32 4294901760, %v3456_v49  ;;  %v4238_v60 = vand.u32 4294901760, %v3577_v28 }
  0x40   :  { %2903 = vmatpush3.bf16.msra.mxu1 %v3464_v50  ;;  %2999 = vmatpush3.bf16.msra.mxu0 %v3464_v50  ;;  %v203_v50 = vand.u32 4294901760, %v3564_v46  ;;  %v3012_v3 = vpack.c.bf16 %v4233_v40, %v4232_v7  ;;  %v4234_v46 = vand.u32 4294901760, %v3571_v35  ;;  %v542_v62 = vsub.f32 %v3584_v31, %v4235_v26 }
  0x41   :  { %2905 = vmatprep.subr.bf16.mxu1 %v3498_v63  ;;  %3001 = vmatprep.subr.bf16.mxu0 %v3498_v63  ;;  %v4237_v40 = vand.u32 4294901760, %v3574_v6  ;;  %v3645_v9 = vsub.f32 %v3577_v28, %v4238_v60  ;;  %v4240_v26 = vand.u32 4294901760, %v3596_v4  ;;  %v3662_v60 = vand.u32 4294901760, %v53_v27 }
  0x42   :  { %v535_v59 = vsub.f32 %v3571_v35, %v4234_v46  ;;  %v4239_v46 = vand.u32 4294901760, %v3399_v21  ;;  %v4242_v11 = vand.u32 4294901760, %v3401_v22  ;;  %v543_v18 = vand.u32 4294901760, %v542_v62 }
  0x43   :  { %v232_v7 = vsub.f32 %v3574_v6, %v4237_v40  ;;  %v54_v40 = vld [vmem:[#allocation2 + $0x70] sm:$0xff] }
  0x44   :  { %2907 = vmatpush3.bf16.msra.mxu1 %v3498_v63  ;;  %3003 = vmatpush3.bf16.msra.mxu0 %v3498_v63  ;;  %v52_v63 = vld [vmem:[#allocation2 + $0x60] sm:$0xff]  ;;  %v3651_v2 = vsub.f32 %v3399_v21, %v4239_v46  ;;  %v3667_v49 = vsub.f32 %v3401_v22, %v4242_v11  ;;  %v4243_v21 = vand.u32 4294901760, %v3474_v55  ;;  %v4248_v11 = vand.u32 4294901760, %v3502_v1 }
  0x45   :  { %2909 = vmatprep.subr.bf16.mxu1 %v3516_v25  ;;  %3005 = vmatprep.subr.bf16.mxu0 %v3516_v25  ;;  %v3629_v19 = vand.u32 4294901760, %v52_v63  ;;  %v4252_v1 = vand.u32 4294901760, %v3584_v31  ;;  %v4255_v55 = vand.u32 4294901760, %v3419_v29 }
  0x46   :  { %v555_v22 = vand.u32 4294901760, %v3667_v49 }
  0x47   :  { %v3675_v46 = vsub.f32 %v52_v63, %v3629_v19 }
  0x48   :  { %2911 = vmatpush3.bf16.msra.mxu1 %v3516_v25  ;;  %3007 = vmatpush3.bf16.msra.mxu0 %v3516_v25  ;;  %v3627_v25 = vand.u32 4294901760, %v51_v23  ;;  %v556_v62 = vsub.f32 %v3667_v49, %v555_v22 }
  0x49   :  { %2913 = vmatprep.subr.bf16.mxu1 %v2912_v15  ;;  %3009 = vmatprep.subr.bf16.mxu0 %v3534_v44  ;;  %4245 = vst [vmem:[#allocation35_spill] sm:$0xff] %v3675_v46 }
  0x4b   :  { %2433 = vmatmul.mubr.f32.vlgmr.msra.gmra.mrb[0].mxu1 %v183_v14  ;;  %2673 = vmatmul.mubr.f32.vlgmr.msra.gmra.mrb[0].mxu0 %v4236_v16  ;;  %v3657_v14 = vsub.f32 %v3596_v4, %v4240_v26  ;;  %v3660_v16 = vsub.f32 %v50_v38, %v3620_v24  ;;  %v548_v38 = vand.u32 4294901760, %v3651_v2  ;;  %v2920_v26 = vpack.c.bf16 %v529_v12, %v522_v0 }
  0x4c   :  { %2915 = vmatpush3.bf16.msra.mxu1 %v2912_v15  ;;  %3011 = vmatpush3.bf16.msra.mxu0 %v3534_v44  ;;  %v3016_v44 = vpack.c.bf16 %v527_v36, %v520_v5  ;;  %v3672_v15 = vsub.f32 %v51_v23, %v3627_v25  ;;  %v536_v24 = vand.u32 4294901760, %v535_v59  ;;  %v223_v36 = vand.u32 4294901760, %v3617_v56  ;;  %v55_v56 = vld [vmem:[#allocation2 + $0x78] sm:$0xff] }
  0x4d   :  { %4241 = vst [vmem:[#allocation33_spill] sm:$0xff] %v3660_v16  ;;  %2435 = vmatprep.mubr.f32.mxu1 %v193_v20  ;;  %2675 = vmatprep.mubr.f32.mxu0 %v4243_v21  ;;  %v4246_v20 = vand.u32 4294901760, %v3489_v61  ;;  %v233_v23 = vand.u32 4294901760, %v232_v7  ;;  %v3682_v5 = vand.u32 4294901760, %v54_v40  ;;  %v549_v63 = vsub.f32 %v3651_v2, %v548_v38  ;;  %v58_v21 = vld [vmem:[#allocation2 + $0x90] sm:$0xff] }
  0x4e   :  { %4244 = vst [vmem:[#allocation34_spill] sm:$0xff] %v3672_v15  ;;  %2917 = vmatprep.subr.bf16.mxu1 %v2916_v51  ;;  %3013 = vmatprep.subr.bf16.mxu0 %v3012_v3  ;;  %v4249_v59 = vand.u32 4294901760, %v3609_v52  ;;  %v3694_v0 = vsub.f32 %v53_v27, %v3662_v60  ;;  %v253_v7 = vand.u32 4294901760, %v3657_v14  ;;  %v4251_v27 = vand.u32 4294901760, %v3571_v35 }
  0x4f   :  { %2436 = vmatmul.mubr.f32.gmra.mrb[2].mxu1 %v203_v50  ;;  %2676 = vmatmul.mubr.f32.gmra.mrb[2].mxu0 %v4246_v20  ;;  %4247 = vst [vmem:[#allocation36_spill] sm:$0xff] %v3682_v5  ;;  %v2924_v50 = vpack.c.bf16 %v543_v18, %v536_v24  ;;  %v3708_v14 = vsub.f32 %v54_v40, %v3682_v5  ;;  %v3710_v20 = vand.u32 4294901760, %v55_v56  ;;  %v4256_v24 = vand.u32 4294901760, %v3421_v30 }
  0x50   :  { %2438 = vmatprep.mubr.f32.mxu1 %v213_v54  ;;  %2678 = vmatprep.mubr.f32.mxu0 %v4248_v11  ;;  %v3690_v12 = vsub.f32 %v3609_v52, %v4249_v59  ;;  %4250 = vst [vmem:[#allocation37_spill] sm:$0xff] %v3694_v0  ;;  %v243_v54 = vand.u32 4294901760, %v3645_v9  ;;  %v56_v11 = vld [vmem:[#allocation2 + $0x80] sm:$0xff]  ;;  %v57_v59 = vld [vmem:[#allocation2 + $0x88] sm:$0xff]  ;;  %v3020_v61 = vpack.c.bf16 %v4252_v1, %v4251_v27  ;;  %v4253_v9 = vand.u32 4294901760, %v3544_v8 }
  0x51   :  { %2919 = vmatpush3.bf16.msra.mxu1 %v2916_v51  ;;  %3015 = vmatpush3.bf16.msra.mxu0 %v3012_v3  ;;  %v550_v51 = vand.u32 4294901760, %v549_v63  ;;  %v557_v3 = vand.u32 4294901760, %v556_v62  ;;  %4254 = vst [vmem:[#allocation38_spill] sm:$0xff] %v3708_v14  ;;  %v3715_v18 = vsub.f32 %v3419_v29, %v4255_v55  ;;  %v3720_v1 = vsub.f32 %v3421_v30, %v4256_v24 }
  0x52   :  { %2921 = vmatprep.subr.bf16.mxu1 %v2920_v26  ;;  %3017 = vmatprep.subr.bf16.mxu0 %v3016_v44  ;;  %v4258_v40 = vand.u32 4294901760, %v3660_v16  ;;  %v3728_v27 = vand.u32 4294901760, %v56_v11  ;;  %v263_v29 = vand.u32 4294901760, %v3690_v12  ;;  %v4259_v30 = vand.u32 4294901760, %v3672_v15 }
  0x53   :  { %2439 = vmatmul.mubr.f32.gmra.mrb[4].mxu1 %v223_v36  ;;  %2679 = vmatmul.mubr.f32.gmra.mrb[4].mxu0 %v4253_v9  ;;  %v4257_v36 = vand.u32 4294901760, %v3574_v6  ;;  %v3730_v9 = vand.u32 4294901760, %v57_v59  ;;  %v569_v24 = vand.u32 4294901760, %v3720_v1  ;;  %v2928_v62 = vpack.c.bf16 %v557_v3, %v550_v51 }
  0x54   :  { %2441 = vmatprep.mubr.f32.mxu1 %v233_v23  ;;  %v272_v63 = vsub.f32 %v3660_v16, %v4258_v40  ;;  %v282_v55 = vsub.f32 %v3672_v15, %v4259_v30  ;;  %v562_v23 = vand.u32 4294901760, %v3715_v18  ;;  %v3024_v6 = vpack.c.bf16 %v555_v22, %v548_v38 }
  0x55   :  { %2681 = vmatprep.mubr.f32.mxu0 %v4257_v36  ;;  %2923 = vmatpush3.bf16.msra.mxu1 %v2920_v26  ;;  %v4260_v36 = vand.u32 4294901760, %v3675_v46  ;;  %v3743_v12 = vand.u32 4294901760, %v58_v21  ;;  %v4261_v26 = vand.u32 4294901760, %v3577_v28  ;;  %v3749_v8 = vsub.f32 %v55_v56, %v3710_v20 }
  0x56   :  { %3019 = vmatpush3.bf16.msra.mxu0 %v3016_v44  ;;  %2925 = vmatprep.subr.bf16.mxu1 %v2924_v50  ;;  %v59_v44 = vld [vmem:[#allocation2 + $0x98] sm:$0xff]  ;;  %v563_v5 = vsub.f32 %v3715_v18, %v562_v23  ;;  %v4262_v51 = vand.u32 4294901760, %v3596_v4  ;;  %v273_v38 = vand.u32 4294901760, %v272_v63  ;;  %v4263_v22 = vand.u32 4294901760, %v3694_v0 }
  0x57   :  { %v3741_v40 = vsub.f32 %v3675_v46, %v4260_v36  ;;  %3021 = vmatprep.subr.bf16.mxu0 %v3020_v61  ;;  %2442 = vmatmul.mubr.f32.gmra.mrb[6].mxu1 %v243_v54  ;;  %v570_v36 = vsub.f32 %v3720_v1, %v569_v24  ;;  %v3761_v3 = vsub.f32 %v56_v11, %v3728_v27  ;;  %v4265_v63 = vand.u32 4294901760, %v3430_v37 }
  0x58   :  { %2682 = vmatmul.mubr.f32.gmra.mrb[6].mxu0 %v4261_v26  ;;  %2444 = vmatprep.mubr.f32.mxu1 %v253_v7  ;;  %v3758_v54 = vsub.f32 %v3694_v0, %v4263_v22  ;;  %v3764_v56 = vsub.f32 %v57_v59, %v3730_v9  ;;  %v3766_v26 = vand.u32 4294901760, %v59_v44  ;;  %v60_v7 = vld [vmem:[#allocation2 + $0xa0] sm:$0xff]  ;;  %v564_v30 = vand.u32 4294901760, %v563_v5  ;;  %v61_v59 = vld [vmem:[#allocation2 + $0xa8] sm:$0xff] }
  0x59   :  { %2684 = vmatprep.mubr.f32.mxu0 %v4262_v51  ;;  %2927 = vmatpush3.bf16.msra.mxu1 %v2924_v50  ;;  %v571_v4 = vand.u32 4294901760, %v570_v36  ;;  %v3771_v51 = vsub.f32 %v3430_v37, %v4265_v63  ;;  %v283_v22 = vand.u32 4294901760, %v282_v55  ;;  %v3774_v11 = vsub.f32 %v58_v21, %v3743_v12 }
  0x5a   :  { %3023 = vmatpush3.bf16.msra.mxu0 %v3020_v61  ;;  %4264 = vst [vmem:[#allocation39_spill] sm:$0xff] %v3766_v26  ;;  %2929 = vmatprep.subr.bf16.mxu1 %v2928_v62  ;;  %v3028_v28 = vpack.c.bf16 %v569_v24, %v562_v23  ;;  %v4266_v61 = vand.u32 4294901760, %v3442_v41  ;;  %v4267_v5 = vand.u32 4294901760, %v3609_v52  ;;  %v4268_v37 = vand.u32 4294901760, %v3708_v14  ;;  %v63_v52 = vld [vmem:[#allocation2 + $0xb8] sm:$0xff] }
  0x5b   :  { %3025 = vmatprep.subr.bf16.mxu0 %v3024_v6  ;;  %2445 = vmatmul.mubr.f32.gmra.mrb[8].mxu1 %v263_v29  ;;  %v2932_v63 = vpack.c.bf16 %v571_v4, %v564_v30  ;;  %v576_v21 = vand.u32 4294901760, %v3771_v51  ;;  %v4269_v23 = vand.u32 4294901760, %v3660_v16  ;;  %v3792_v24 = vand.u32 4294901760, %v60_v7 }
  0x5c   :  { %v3779_v50 = vsub.f32 %v3442_v41, %v4266_v61  ;;  %2685 = vmatmul.mubr.f32.gmra.mrb[8].mxu0 %v4267_v5  ;;  %v312_v55 = vsub.f32 %v3708_v14, %v4268_v37  ;;  %2447 = vmatprep.mubr.f32.mxu1 %v273_v38  ;;  %v293_v41 = vand.u32 4294901760, %v3741_v40  ;;  %v62_v61 = vld [vmem:[#allocation2 + $0xb0] sm:$0xff]  ;;  %v3797_v4 = vsub.f32 %v59_v44, %v3766_v26 }
  0x5d   :  { %2687 = vmatprep.mubr.f32.mxu0 %v4269_v23  ;;  %2931 = vmatpush3.bf16.msra.mxu1 %v2928_v62  ;;  %v3799_v30 = vand.u32 4294901760, %v61_v59  ;;  %v577_v38 = vsub.f32 %v3771_v51, %v576_v21  ;;  %v303_v40 = vand.u32 4294901760, %v3758_v54  ;;  %v4271_v62 = vand.u32 4294901760, %v3672_v15 }
  0x5e   :  { %v583_v5 = vand.u32 4294901760, %v3779_v50  ;;  %3027 = vmatpush3.bf16.msra.mxu0 %v3024_v6  ;;  %2933 = vmatprep.subr.bf16.mxu1 %v2932_v63  ;;  %v313_v6 = vand.u32 4294901760, %v312_v55  ;;  %v4272_v44 = vand.u32 4294901760, %v3749_v8  ;;  %v3810_v16 = vand.u32 4294901760, %v62_v61 }
  0x5f   :  { %4270 = vst [vmem:[#allocation40_spill] sm:$0xff] %v3799_v30  ;;  %3029 = vmatprep.subr.bf16.mxu0 %v3028_v28  ;;  %2448 = vmatmul.mubr.f32.gmra.mrb[10].mxu1 %v283_v22  ;;  %v578_v54 = vand.u32 4294901760, %v577_v38  ;;  %v4274_v23 = vand.u32 4294901760, %v3675_v46  ;;  %v4275_v26 = vand.u32 4294901760, %v3761_v3  ;;  %v4279_v46 = vand.u32 4294901760, %v3774_v11 }
  0x60   :  { %v584_v29 = vsub.f32 %v3779_v50, %v583_v5  ;;  %v3032_v36 = vpack.c.bf16 %v583_v5, %v576_v21  ;;  %2688 = vmatmul.mubr.f32.gmra.mrb[10].mxu0 %v4271_v62  ;;  %v322_v37 = vsub.f32 %v3749_v8, %v4272_v44  ;;  %4273 = vst [vmem:[#allocation41_spill] sm:$0xff] %v3810_v16  ;;  %v4276_v5 = vand.u32 4294901760, %v3451_v47 }
  0x61   :  { %2450 = vmatprep.mubr.f32.mxu1 %v293_v41  ;;  %2690 = vmatprep.mubr.f32.mxu0 %v4274_v23  ;;  %v332_v22 = vsub.f32 %v3761_v3, %v4275_v26  ;;  %v3818_v21 = vsub.f32 %v60_v7, %v3792_v24  ;;  %v4277_v44 = vand.u32 4294901760, %v3764_v56  ;;  %v3828_v23 = vsub.f32 %v61_v59, %v3799_v30  ;;  %v64_v26 = vld [vmem:[#allocation2 + $0xc0] sm:$0xff] }
  0x62   :  { %v585_v55 = vand.u32 4294901760, %v584_v29  ;;  %v589_v62 = vsub.f32 %v3451_v47, %v4276_v5  ;;  %2935 = vmatpush3.bf16.msra.mxu1 %v2932_v63  ;;  %3031 = vmatpush3.bf16.msra.mxu0 %v3028_v28  ;;  %v4278_v7 = vand.u32 4294901760, %v3453_v48  ;;  %v352_v47 = vsub.f32 %v3774_v11, %v4279_v46 }
  0x63   :  { %v342_v38 = vsub.f32 %v3764_v56, %v4277_v44  ;;  %v3836_v5 = vand.u32 4294901760, %v63_v52  ;;  %3033 = vmatprep.subr.bf16.mxu0 %v3032_v36  ;;  %2451 = vmatmul.mubr.f32.gmra.mrb[12].mxu1 %v303_v40  ;;  %v4280_v59 = vand.u32 4294901760, %v3694_v0  ;;  %v323_v63 = vand.u32 4294901760, %v322_v37  ;;  %v66_v37 = vld [vmem:[#allocation2 + $0xd0] sm:$0xff] }
  0x64   :  { %v596_v29 = vsub.f32 %v3453_v48, %v4278_v7  ;;  %v2936_v15 = vpack.c.bf16 %v585_v55, %v578_v54  ;;  %v590_v44 = vand.u32 4294901760, %v589_v62  ;;  %v3841_v28 = vsub.f32 %v62_v61, %v3810_v16  ;;  %2453 = vmatprep.mubr.f32.mxu1 %v313_v6  ;;  %v65_v54 = vld [vmem:[#allocation2 + $0xc8] sm:$0xff] }
  0x65   :  { %2691 = vmatmul.mubr.f32.gmra.mrb[12].mxu0 %v4280_v59  ;;  %v4281_v48 = vand.u32 4294901760, %v3708_v14  ;;  %v333_v7 = vand.u32 4294901760, %v332_v22  ;;  %v3846_v30 = vand.u32 4294901760, %v64_v26  ;;  %v343_v40 = vand.u32 4294901760, %v342_v38 }
  0x66   :  { %v597_v41 = vand.u32 4294901760, %v596_v29  ;;  %v591_v55 = vsub.f32 %v589_v62, %v590_v44  ;;  %2937 = vmatprep.subr.bf16.mxu1 %v2936_v15  ;;  %3035 = vmatpush3.bf16.msra.mxu0 %v3032_v36  ;;  %v353_v16 = vand.u32 4294901760, %v352_v47  ;;  %v4282_v6 = vand.u32 4294901760, %v3797_v4 }
  0x67   :  { %2693 = vmatprep.mubr.f32.mxu0 %v4281_v48  ;;  %v3853_v22 = vsub.f32 %v63_v52, %v3836_v5  ;;  %2939 = vmatpush3.bf16.msra.mxu1 %v2936_v15  ;;  %v4283_v38 = vand.u32 4294901760, %v3749_v8  ;;  %v391_v0 = vand.u32 4294901760, %v3841_v28  ;;  %v3858_v36 = vand.u32 4294901760, %v65_v54 }
  0x68   :  { %v598_v61 = vsub.f32 %v596_v29, %v597_v41  ;;  %v3036_v59 = vpack.c.bf16 %v597_v41, %v590_v44  ;;  %v362_v48 = vsub.f32 %v3797_v4, %v4282_v6  ;;  %v592_v46 = vand.u32 4294901760, %v591_v55  ;;  %2454 = vmatmul.mubr.f32.gmra.mrb[14].mxu1 %v323_v63  ;;  %v67_v55 = vld [vmem:[#allocation2 + $0xd8] sm:$0xff] }
  0x69   :  { %2694 = vmatmul.mubr.f32.gmra.mrb[14].mxu0 %v4283_v38  ;;  %v3862_v41 = vpack.c.bf16 %v3484_v58, %v3479_v57  ;;  %2456 = vmatprep.mubr.f32.mxu1 %v333_v7  ;;  %v4284_v47 = vand.u32 4294901760, %v3761_v3  ;;  %v4285_v52 = vand.u32 4294901760, %v3818_v21  ;;  %v3870_v44 = vsub.f32 %v64_v26, %v3846_v30  ;;  %v68_v7 = vld [vmem:[#allocation2 + $0xe0] sm:$0xff] }
  0x6a   :  { %v599_v14 = vand.u32 4294901760, %v598_v61  ;;  %v3872_v63 = vand.u32 4294901760, %v66_v37  ;;  %v3876_v61 = vpack.c.bf16 %v3527_v34, %v3522_v32  ;;  %v4287_v57 = vand.u32 4294901760, %v3828_v23  ;;  %3037 = vmatprep.subr.bf16.mxu0 %v3036_v59 }
  0x6b   :  { %2696 = vmatprep.mubr.f32.mxu0 %v4284_v47  ;;  %v372_v15 = vsub.f32 %v3818_v21, %v4285_v52  ;;  %4286 = vst [vmem:[#allocation42_spill] sm:$0xff] %v3870_v44  ;;  %v3883_v38 = vpack.c.bf16 %v3584_v31, %v3571_v35  ;;  %v3887_v26 = vpack.c.bf16 %v3667_v49, %v3651_v2  ;;  %v401_v47 = vand.u32 4294901760, %v3853_v22 }
  0x6c   :  { %v382_v58 = vsub.f32 %v3828_v23, %v4287_v57  ;;  %v2940_v6 = vpack.c.bf16 %v599_v14, %v592_v46  ;;  %3039 = vmatpush3.bf16.msra.mxu0 %v3036_v59  ;;  %v3892_v32 = vpack.c.bf16 %v3720_v1, %v3715_v18  ;;  %v3896_v34 = vpack.c.bf16 %v3779_v50, %v3771_v51  ;;  %v69_v46 = vld [vmem:[#allocation2 + $0xe8] sm:$0xff] }
  0x6d   :  { %v3898_v14 = vpack.c.bf16 %v596_v29, %v589_v62  ;;  %2457 = vmatmul.mubr.f32.gmra.mrb[16].mxu1 %v343_v40  ;;  %v4288_v35 = vand.u32 4294901760, %v3764_v56  ;;  %v363_v31 = vand.u32 4294901760, %v362_v48  ;;  %v392_v49 = vsub.f32 %v3841_v28, %v391_v0  ;;  %v70_v40 = vld [vmem:[#allocation2 + $0xf0] sm:$0xff]  ;;  %3041 = vmatprep.subr.bf16.mxu0 %v3369_v10 }
  0x6e   :  { %v3906_v2 = vsub.f32 %v65_v54, %v3858_v36  ;;  %v3908_v18 = vand.u32 4294901760, %v67_v55  ;;  %2459 = vmatprep.mubr.f32.mxu1 %v353_v16  ;;  %v4290_v1 = vand.u32 4294901760, %v3774_v11  ;;  %v373_v51 = vand.u32 4294901760, %v372_v15  ;;  %2941 = vmatprep.subr.bf16.mxu1 %v2940_v6 }
  0x6f   :  { %2697 = vmatmul.mubr.f32.gmra.mrb[16].mxu0 %v4288_v35  ;;  %v411_v50 = vand.u32 4294901760, %v3870_v44  ;;  %v3914_v62 = vsub.f32 %v66_v37, %v3872_v63  ;;  %v3916_v29 = vand.u32 4294901760, %v68_v7  ;;  %v3920_v54 = vpack.c.bf16 %v3444_v42, %v3432_v39  ;;  %2943 = vmatpush3.bf16.msra.mxu1 %v2940_v6 }
  0x70   :  { %4289 = vst [vmem:[#allocation43_spill] sm:$0xff] %v3906_v2  ;;  %2699 = vmatprep.mubr.f32.mxu0 %v4290_v1  ;;  %v383_v16 = vand.u32 4294901760, %v382_v58  ;;  %v402_v59 = vsub.f32 %v3853_v22, %v401_v47  ;;  %v4292_v48 = vand.u32 4294901760, %v3797_v4  ;;  %v393_v37 = vand.u32 4294901760, %v392_v49 }
  0x71   :  { %4291 = vst [vmem:[#allocation44_spill] sm:$0xff] %v3914_v62  ;;  %2460 = vmatmul.mubr.f32.gmra.mrb[18].mxu1 %v363_v31  ;;  %v421_v52 = vand.u32 4294901760, %v3906_v2  ;;  %v3928_v15 = vsub.f32 %v67_v55, %v3908_v18  ;;  %v3930_v57 = vand.u32 4294901760, %v69_v46  ;;  %v4293_v39 = vand.u32 4294901760, %v3818_v21  ;;  %v71_v31 = vld [vmem:[#allocation2 + $0xf8] sm:$0xff]  ;;  %2945 = vmatprep.subr.bf16.mxu1 %v3920_v54 }
  0x72   :  { %2462 = vmatprep.mubr.f32.mxu1 %v373_v51  ;;  %v412_v42 = vsub.f32 %v3870_v44, %v411_v50  ;;  %v431_v58 = vand.u32 4294901760, %v3914_v62  ;;  %v3937_v6 = vsub.f32 %v68_v7, %v3916_v29  ;;  %v3939_v35 = vand.u32 4294901760, %v70_v40 }
  0x73   :  { %2700 = vmatmul.mubr.f32.gmra.mrb[18].mxu0 %v4292_v48  ;;  %v403_v55 = vand.u32 4294901760, %v402_v59  ;;  %v4294_v49 = vand.u32 4294901760, %v3828_v23  ;;  %v422_v1 = vsub.f32 %v3906_v2, %v421_v52  ;;  %v441_v51 = vand.u32 4294901760, %v3928_v15 }
  0x74   :  { %2702 = vmatprep.mubr.f32.mxu0 %v4293_v39  ;;  %v3947_v48 = vsub.f32 %v69_v46, %v3930_v57  ;;  %v3949_v39 = vand.u32 4294901760, %v71_v31  ;;  %v413_v7 = vand.u32 4294901760, %v412_v42  ;;  %v432_v59 = vsub.f32 %v3914_v62, %v431_v58 }
  0x75   :  { %2463 = vmatmul.mubr.f32.gmra.mrb[20].mxu1 %v383_v16  ;;  %v451_v16 = vand.u32 4294901760, %v3937_v6  ;;  %v423_v2 = vand.u32 4294901760, %v422_v1  ;;  %v442_v46 = vsub.f32 %v3928_v15, %v441_v51 }
  0x76   :  { %2465 = vmatprep.mubr.f32.mxu1 %v393_v37  ;;  %v461_v44 = vand.u32 4294901760, %v3947_v48  ;;  %v3961_v37 = vsub.f32 %v71_v31, %v3949_v39 }
  0x77   :  { %2703 = vmatmul.mubr.f32.gmra.mrb[20].mxu0 %v4294_v49  ;;  %v3956_v49 = vsub.f32 %v70_v40, %v3939_v35  ;;  %v452_v42 = vsub.f32 %v3937_v6, %v451_v16  ;;  %v443_v40 = vand.u32 4294901760, %v442_v46  ;;  %v4311_v46 = vld [vmem:[#allocation12_spill] sm:$0xff] }
  0x78   :  { %2705 = vmatprep.mubr.f32.mxu0 %v391_v0  ;;  %v433_v0 = vand.u32 4294901760, %v432_v59 }
  0x79   :  { %2466 = vmatmul.mubr.f32.gmra.mrb[22].mxu1 %v403_v55  ;;  %v471_v62 = vand.u32 4294901760, %v3956_v49  ;;  %v481_v55 = vand.u32 4294901760, %v3961_v37  ;;  %v453_v1 = vand.u32 4294901760, %v452_v42  ;;  %v4313_v42 = vld [vmem:[#allocation17_spill] sm:$0xff] }
  0x7a   :  { %2468 = vmatprep.mubr.f32.mxu1 %v413_v7 }
  0x7b   :  { %2706 = vmatmul.mubr.f32.gmra.mrb[22].mxu0 %v401_v47  ;;  %v462_v47 = vsub.f32 %v3947_v48, %v461_v44  ;;  %v472_v31 = vsub.f32 %v3956_v49, %v471_v62  ;;  %v482_v7 = vsub.f32 %v3961_v37, %v481_v55 }
  0x7c   :  { %2708 = vmatprep.mubr.f32.mxu0 %v411_v50 }
  0x7d   :  { %2469 = vmatmul.mubr.f32.gmra.mrb[24].mxu1 %v423_v2  ;;  %v463_v50 = vand.u32 4294901760, %v462_v47  ;;  %v473_v59 = vand.u32 4294901760, %v472_v31  ;;  %v483_v2 = vand.u32 4294901760, %v482_v7  ;;  %v4315_v47 = vld [vmem:[#allocation20_spill] sm:$0xff]  ;;  %v4323_v31 = vld [vmem:[#allocation35_spill] sm:$0xff]  ;;  %v4325_v7 = vld [vmem:[#allocation38_spill] sm:$0xff] }
  0x7e   :  { %2471 = vmatprep.mubr.f32.mxu1 %v433_v0  ;;  %v4312_v0 = vld [vmem:[#allocation15_spill] sm:$0xff] }
  0x7f   :  { %2709 = vmatmul.mubr.f32.gmra.mrb[24].mxu0 %v421_v52  ;;  %v4302_v52 = vld [vmem:[#allocation29_spill] sm:$0xff] }
  0x80   :  { %2711 = vmatprep.mubr.f32.mxu0 %v431_v58  ;;  %v4303_v58 = vld [vmem:[#allocation32_spill] sm:$0xff] }
  0x81   :  { %2472 = vmatmul.mubr.f32.gmra.mrb[26].mxu1 %v443_v40  ;;  %v4314_v40 = vld [vmem:[#allocation18_spill] sm:$0xff] }
  0x82   :  { %2474 = vmatprep.mubr.f32.mxu1 %v453_v1  ;;  %v4322_v1 = vld [vmem:[#allocation34_spill] sm:$0xff] }
  0x83   :  { %2712 = vmatmul.mubr.f32.gmra.mrb[26].mxu0 %v441_v51  ;;  %v4306_v51 = vld [vmem:[#allocation36_spill] sm:$0xff] }
  0x84   :  { %2714 = vmatprep.mubr.f32.mxu0 %v451_v16  ;;  %v4309_v16 = vld [vmem:[#allocation40_spill] sm:$0xff] }
  0x85   :  { %2475 = vmatmul.mubr.f32.gmra.mrb[28].mxu1 %v463_v50  ;;  %v4324_v50 = vld [vmem:[#allocation37_spill] sm:$0xff] }
  0x86   :  { %2477 = vmatprep.mubr.f32.mxu1 %v473_v59 }
  0x87   :  { %2715 = vmatmul.mubr.f32.gmra.mrb[28].mxu0 %v461_v44  ;;  %v4296_v44 = vld [vmem:[#allocation21_spill] sm:$0xff] }
  0x88   :  { %2717 = vmatprep.mubr.f32.mxu0 %v471_v62  ;;  %v4297_v62 = vld [vmem:[#allocation23_spill] sm:$0xff] }
  0x89   :  { %2478 = vmatmul.mubr.f32.gmra.mrb[30].mxu1 %v483_v2 }
  0x8a   :  { %2512 = vmatprep.mubr.f32.mxu1 %v3387_v17 }
  0x8b   :  { %2718 = vmatmul.mubr.f32.gmra.mrb[30].mxu0 %v481_v55  ;;  %v4316_v55 = vld [vmem:[#allocation25_spill] sm:$0xff] }
  0x8c   :  { %2752 = vmatprep.mubr.f32.mxu0 %v3387_v17 }
  0x8d   :  { %2513 = vmatmul.mubr.f32.vlgmr.msra.gmra.mrb[0].mxu1 %v3424_v33 }
  0x8e   :  { %2947 = vmatpush3.bf16.msra.mxu1 %v3920_v54  ;;  %2515 = vmatprep.mubr.f32.mxu1 %v3446_v43  ;;  %v4300_v54 = vld [vmem:[#allocation26_spill] sm:$0xff] }
  0x8f   :  { %2753 = vmatmul.mubr.f32.vlgmr.msra.gmra.mrb[0].mxu0 %v3424_v33  ;;  %2949 = vmatprep.subr.bf16.mxu1 %v3862_v41 }
  0x90   :  { %3043 = vmatpush3.bf16.msra.mxu0 %v3369_v10  ;;  %2755 = vmatprep.mubr.f32.mxu0 %v3446_v43  ;;  %v4295_v10 = vld [vmem:[#allocation11_spill] sm:$0xff] }
  0x91   :  { %3045 = vmatprep.subr.bf16.mxu0 %v3377_v13  ;;  %2516 = vmatmul.mubr.f32.gmra.mrb[2].mxu1 %v3448_v45 }
  0x92   :  { %2518 = vmatprep.mubr.f32.mxu1 %v3468_v53  ;;  %2951 = vmatpush3.bf16.msra.mxu1 %v3862_v41  ;;  %v4298_v41 = vld [vmem:[#allocation13_spill] sm:$0xff] }
  0x93   :  { %2756 = vmatmul.mubr.f32.gmra.mrb[2].mxu0 %v3448_v45  ;;  %2953 = vmatprep.subr.bf16.mxu1 %v3876_v61 }
  0x94   :  { %2758 = vmatprep.mubr.f32.mxu0 %v3468_v53  ;;  %3047 = vmatpush3.bf16.msra.mxu0 %v3377_v13  ;;  %v4299_v13 = vld [vmem:[#allocation24_spill] sm:$0xff] }
  0x95   :  { %3049 = vmatprep.subr.bf16.mxu0 %v4295_v10  ;;  %2519 = vmatmul.mubr.f32.gmra.mrb[4].mxu1 %v4296_v44 }
  0x96   :  { %2521 = vmatprep.mubr.f32.mxu1 %v4297_v62  ;;  %2955 = vmatpush3.bf16.msra.mxu1 %v3876_v61  ;;  %v4301_v61 = vld [vmem:[#allocation14_spill] sm:$0xff] }
  0x97   :  { %2759 = vmatmul.mubr.f32.gmra.mrb[4].mxu0 %v4296_v44  ;;  %2957 = vmatprep.subr.bf16.mxu1 %v3883_v38 }
  0x98   :  { %2761 = vmatprep.mubr.f32.mxu0 %v4297_v62  ;;  %3051 = vmatpush3.bf16.msra.mxu0 %v4295_v10 }
  0x99   :  { %3053 = vmatprep.subr.bf16.mxu0 %v4298_v41  ;;  %2522 = vmatmul.mubr.f32.gmra.mrb[6].mxu1 %v4299_v13 }
  0x9a   :  { %2524 = vmatprep.mubr.f32.mxu1 %v4300_v54  ;;  %2959 = vmatpush3.bf16.msra.mxu1 %v3883_v38  ;;  %v4304_v38 = vld [vmem:[#allocation16_spill] sm:$0xff] }
  0x9b   :  { %2762 = vmatmul.mubr.f32.gmra.mrb[6].mxu0 %v4299_v13  ;;  %2961 = vmatprep.subr.bf16.mxu1 %v3887_v26 }
  0x9c   :  { %2764 = vmatprep.mubr.f32.mxu0 %v4300_v54  ;;  %3055 = vmatpush3.bf16.msra.mxu0 %v4298_v41 }
  0x9d   :  { %3057 = vmatprep.subr.bf16.mxu0 %v4301_v61  ;;  %2525 = vmatmul.mubr.f32.gmra.mrb[8].mxu1 %v4302_v52 }
  0x9e   :  { %2527 = vmatprep.mubr.f32.mxu1 %v4303_v58  ;;  %2963 = vmatpush3.bf16.msra.mxu1 %v3887_v26  ;;  %v4305_v26 = vld [vmem:[#allocation19_spill] sm:$0xff] }
  0x9f   :  { %2765 = vmatmul.mubr.f32.gmra.mrb[8].mxu0 %v4302_v52  ;;  %2965 = vmatprep.subr.bf16.mxu1 %v3892_v32 }
  0xa0   :  { %2767 = vmatprep.mubr.f32.mxu0 %v4303_v58  ;;  %3059 = vmatpush3.bf16.msra.mxu0 %v4301_v61 }
  0xa1   :  { %3061 = vmatprep.subr.bf16.mxu0 %v4304_v38  ;;  %2528 = vmatmul.mubr.f32.gmra.mrb[10].mxu1 %v3627_v25 }
  0xa2   :  { %2530 = vmatprep.mubr.f32.mxu1 %v3629_v19  ;;  %2967 = vmatpush3.bf16.msra.mxu1 %v3892_v32  ;;  %v4307_v32 = vld [vmem:[#allocation22_spill] sm:$0xff] }
  0xa3   :  { %2768 = vmatmul.mubr.f32.gmra.mrb[10].mxu0 %v3627_v25  ;;  %2969 = vmatprep.subr.bf16.mxu1 %v3896_v34 }
  0xa4   :  { %2770 = vmatprep.mubr.f32.mxu0 %v3629_v19  ;;  %3063 = vmatpush3.bf16.msra.mxu0 %v4304_v38 }
  0xa5   :  { %3065 = vmatprep.subr.bf16.mxu0 %v4305_v26  ;;  %2531 = vmatmul.mubr.f32.gmra.mrb[12].mxu1 %v3662_v60 }
  0xa6   :  { %2533 = vmatprep.mubr.f32.mxu1 %v4306_v51  ;;  %2971 = vmatpush3.bf16.msra.mxu1 %v3896_v34  ;;  %v4308_v34 = vld [vmem:[#allocation39_spill] sm:$0xff] }
  0xa7   :  { %2771 = vmatmul.mubr.f32.gmra.mrb[12].mxu0 %v3662_v60  ;;  %2973 = vmatprep.subr.bf16.mxu1 %v3898_v14 }
  0xa8   :  { %2773 = vmatprep.mubr.f32.mxu0 %v4306_v51  ;;  %3067 = vmatpush3.bf16.msra.mxu0 %v4305_v26 }
  0xa9   :  { %3069 = vmatprep.subr.bf16.mxu0 %v4307_v32  ;;  %2534 = vmatmul.mubr.f32.gmra.mrb[14].mxu1 %v3710_v20 }
  0xaa   :  { %2536 = vmatprep.mubr.f32.mxu1 %v3728_v27  ;;  %2975 = vmatpush3.bf16.msra.mxu1 %v3898_v14  ;;  %v4310_v14 = vld [vmem:[#allocation41_spill] sm:$0xff] }
  0xab   :  { %2774 = vmatmul.mubr.f32.gmra.mrb[14].mxu0 %v3710_v20 }
  0xac   :  { %2776 = vmatprep.mubr.f32.mxu0 %v3728_v27  ;;  %3071 = vmatpush3.bf16.msra.mxu0 %v4307_v32 }
  0xad   :  { %2537 = vmatmul.mubr.f32.gmra.mrb[16].mxu1 %v3730_v9 }
  0xae   :  { %2539 = vmatprep.mubr.f32.mxu1 %v3743_v12 }
  0xaf   :  { %2777 = vmatmul.mubr.f32.gmra.mrb[16].mxu0 %v3730_v9 }
  0xb0   :  { %2779 = vmatprep.mubr.f32.mxu0 %v3743_v12 }
  0xb1   :  { %2540 = vmatmul.mubr.f32.gmra.mrb[18].mxu1 %v4308_v34 }
  0xb2   :  { %2542 = vmatprep.mubr.f32.mxu1 %v3792_v24 }
  0xb3   :  { %2780 = vmatmul.mubr.f32.gmra.mrb[18].mxu0 %v4308_v34 }
  0xb4   :  { %2782 = vmatprep.mubr.f32.mxu0 %v3792_v24 }
  0xb5   :  { %2543 = vmatmul.mubr.f32.gmra.mrb[20].mxu1 %v4309_v16 }
  0xb6   :  { %2545 = vmatprep.mubr.f32.mxu1 %v4310_v14 }
  0xb7   :  { %2783 = vmatmul.mubr.f32.gmra.mrb[20].mxu0 %v4309_v16 }
  0xb8   :  { %2785 = vmatprep.mubr.f32.mxu0 %v4310_v14 }
  0xb9   :  { %2546 = vmatmul.mubr.f32.gmra.mrb[22].mxu1 %v3836_v5 }
  0xba   :  { %2548 = vmatprep.mubr.f32.mxu1 %v3846_v30 }
  0xbb   :  { %2786 = vmatmul.mubr.f32.gmra.mrb[22].mxu0 %v3836_v5 }
  0xbc   :  { %2788 = vmatprep.mubr.f32.mxu0 %v3846_v30 }
  0xbd   :  { %2549 = vmatmul.mubr.f32.gmra.mrb[24].mxu1 %v3858_v36 }
  0xbe   :  { %2551 = vmatprep.mubr.f32.mxu1 %v3872_v63 }
  0xbf   :  { %2789 = vmatmul.mubr.f32.gmra.mrb[24].mxu0 %v3858_v36 }
  0xc0   :  { %2791 = vmatprep.mubr.f32.mxu0 %v3872_v63 }
  0xc1   :  { %2552 = vmatmul.mubr.f32.gmra.mrb[26].mxu1 %v3908_v18 }
  0xc2   :  { %2554 = vmatprep.mubr.f32.mxu1 %v3916_v29 }
  0xc3   :  { %2792 = vmatmul.mubr.f32.gmra.mrb[26].mxu0 %v3908_v18 }
  0xc4   :  { %2794 = vmatprep.mubr.f32.mxu0 %v3916_v29 }
  0xc5   :  { %2555 = vmatmul.mubr.f32.gmra.mrb[28].mxu1 %v3930_v57 }
  0xc6   :  { %2557 = vmatprep.mubr.f32.mxu1 %v3939_v35 }
  0xc7   :  { %2795 = vmatmul.mubr.f32.gmra.mrb[28].mxu0 %v3930_v57 }
  0xc8   :  { %2797 = vmatprep.mubr.f32.mxu0 %v3939_v35 }
  0xc9   :  { %2558 = vmatmul.mubr.f32.gmra.mrb[30].mxu1 %v3949_v39 }
  0xca   :  { %2592 = vmatprep.mubr.f32.mxu1 %v4311_v46 }
  0xcb   :  { %2798 = vmatmul.mubr.f32.gmra.mrb[30].mxu0 %v3949_v39 }
  0xcc   :  { %2832 = vmatprep.mubr.f32.mxu0 %v3387_v17  ;;  %v4317_v17 = vld [vmem:[#allocation27_spill] sm:$0xff] }
  0xcd   :  { %2593 = vmatmul.mubr.f32.vlgmr.msra.gmra.mrb[0].mxu1 %v4312_v0 }
  0xce   :  { %2595 = vmatprep.mubr.f32.mxu1 %v4313_v42 }
  0xcf   :  { %2833 = vmatmul.mubr.f32.vlgmr.msra.gmra.mrb[0].mxu0 %v3424_v33  ;;  %v4318_v33 = vld [vmem:[#allocation28_spill] sm:$0xff] }
  0xd0   :  { %2835 = vmatprep.mubr.f32.mxu0 %v3446_v43  ;;  %v4319_v43 = vld [vmem:[#allocation30_spill] sm:$0xff] }
  0xd1   :  { %2596 = vmatmul.mubr.f32.gmra.mrb[2].mxu1 %v4314_v40 }
  0xd2   :  { %2598 = vmatprep.mubr.f32.mxu1 %v4315_v47 }
  0xd3   :  { %2836 = vmatmul.mubr.f32.gmra.mrb[2].mxu0 %v3448_v45  ;;  %v4320_v45 = vld [vmem:[#allocation31_spill] sm:$0xff] }
  0xd4   :  { %2838 = vmatprep.mubr.f32.mxu0 %v3468_v53  ;;  %v4321_v53 = vld [vmem:[#allocation33_spill] sm:$0xff] }
  0xd5   :  { %2599 = vmatmul.mubr.f32.gmra.mrb[4].mxu1 %v4316_v55 }
  0xd6   :  { %2601 = vmatprep.mubr.f32.mxu1 %v4317_v17 }
  0xd7   :  { %2839 = vmatmul.mubr.f32.gmra.mrb[4].mxu0 %v4296_v44 }
  0xd8   :  { %2841 = vmatprep.mubr.f32.mxu0 %v4297_v62 }
  0xd9   :  { %2602 = vmatmul.mubr.f32.gmra.mrb[6].mxu1 %v4318_v33 }
  0xda   :  { %2604 = vmatprep.mubr.f32.mxu1 %v4319_v43 }
  0xdb   :  { %2842 = vmatmul.mubr.f32.gmra.mrb[6].mxu0 %v4299_v13 }
  0xdc   :  { %2844 = vmatprep.mubr.f32.mxu0 %v4300_v54 }
  0xdd   :  { %2605 = vmatmul.mubr.f32.gmra.mrb[8].mxu1 %v4320_v45 }
  0xde   :  { %2607 = vmatprep.mubr.f32.mxu1 %v4321_v53 }
  0xdf   :  { %2845 = vmatmul.mubr.f32.gmra.mrb[8].mxu0 %v4302_v52 }
  0xe0   :  { %2847 = vmatprep.mubr.f32.mxu0 %v4303_v58 }
  0xe1   :  { %2608 = vmatmul.mubr.f32.gmra.mrb[10].mxu1 %v4322_v1 }
  0xe2   :  { %2610 = vmatprep.mubr.f32.mxu1 %v4323_v31 }
  0xe3   :  { %2848 = vmatmul.mubr.f32.gmra.mrb[10].mxu0 %v3627_v25  ;;  %v4326_v25 = vld [vmem:[#allocation42_spill] sm:$0xff] }
  0xe4   :  { %2850 = vmatprep.mubr.f32.mxu0 %v3629_v19  ;;  %v4328_v19 = vld [vmem:[#allocation44_spill] sm:$0xff] }
  0xe5   :  { %2611 = vmatmul.mubr.f32.gmra.mrb[12].mxu1 %v4324_v50 }
  0xe6   :  { %2613 = vmatprep.mubr.f32.mxu1 %v4325_v7 }
  0xe7   :  { %2851 = vmatmul.mubr.f32.gmra.mrb[12].mxu0 %v3662_v60 }
  0xe8   :  { %2853 = vmatprep.mubr.f32.mxu0 %v4306_v51 }
  0xe9   :  { %2614 = vmatmul.mubr.f32.gmra.mrb[14].mxu1 %v3749_v8  ;;  %v4327_v8 = vld [vmem:[#allocation43_spill] sm:$0xff] }
  0xea   :  { %2616 = vmatprep.mubr.f32.mxu1 %v3761_v3 }
  0xeb   :  { %2854 = vmatmul.mubr.f32.gmra.mrb[14].mxu0 %v3710_v20 }
  0xec   :  { %2856 = vmatprep.mubr.f32.mxu0 %v3728_v27 }
  0xed   :  { %2617 = vmatmul.mubr.f32.gmra.mrb[16].mxu1 %v3764_v56 }
  0xee   :  { %2619 = vmatprep.mubr.f32.mxu1 %v3774_v11 }
  0xef   :  { %2857 = vmatmul.mubr.f32.gmra.mrb[16].mxu0 %v3730_v9 }
  0xf0   :  { %2859 = vmatprep.mubr.f32.mxu0 %v3743_v12 }
  0xf1   :  { %2620 = vmatmul.mubr.f32.gmra.mrb[18].mxu1 %v3797_v4 }
  0xf2   :  { %2622 = vmatprep.mubr.f32.mxu1 %v3818_v21 }
  0xf3   :  { %2860 = vmatmul.mubr.f32.gmra.mrb[18].mxu0 %v4308_v34 }
  0xf4   :  { %2862 = vmatprep.mubr.f32.mxu0 %v3792_v24 }
  0xf5   :  { %2623 = vmatmul.mubr.f32.gmra.mrb[20].mxu1 %v3828_v23 }
  0xf6   :  { %2625 = vmatprep.mubr.f32.mxu1 %v3841_v28 }
  0xf7   :  { %2863 = vmatmul.mubr.f32.gmra.mrb[20].mxu0 %v4309_v16 }
  0xf8   :  { %2865 = vmatprep.mubr.f32.mxu0 %v4310_v14 }
  0xf9   :  { %2626 = vmatmul.mubr.f32.gmra.mrb[22].mxu1 %v3853_v22 }
  0xfa   :  { %2628 = vmatprep.mubr.f32.mxu1 %v4326_v25 }
  0xfb   :  { %2866 = vmatmul.mubr.f32.gmra.mrb[22].mxu0 %v3836_v5 }
  0xfc   :  { %2868 = vmatprep.mubr.f32.mxu0 %v3846_v30 }
  0xfd   :  { %2629 = vmatmul.mubr.f32.gmra.mrb[24].mxu1 %v4327_v8 }
  0xfe   :  { %2631 = vmatprep.mubr.f32.mxu1 %v4328_v19 }
  0xff   :  { %2869 = vmatmul.mubr.f32.gmra.mrb[24].mxu0 %v3858_v36 }
 0x100   :  { %2871 = vmatprep.mubr.f32.mxu0 %v3872_v63 }
 0x101   :  { %2632 = vmatmul.mubr.f32.gmra.mrb[26].mxu1 %v3928_v15 }
 0x102   :  { %2634 = vmatprep.mubr.f32.mxu1 %v3937_v6 }
 0x103   :  { %2872 = vmatmul.mubr.f32.gmra.mrb[26].mxu0 %v3908_v18 }
 0x104   :  { %2874 = vmatprep.mubr.f32.mxu0 %v3916_v29 }
 0x105   :  { %2635 = vmatmul.mubr.f32.gmra.mrb[28].mxu1 %v3947_v48 }
 0x106   :  { %2637 = vmatprep.mubr.f32.mxu1 %v3956_v49 }
 0x107   :  { %2875 = vmatmul.mubr.f32.gmra.mrb[28].mxu0 %v3930_v57 }
 0x108   :  { %2877 = vmatprep.mubr.f32.mxu0 %v3939_v35 }
 0x109   :  { %2638 = vmatmul.mubr.f32.gmra.mrb[30].mxu1 %v3961_v37 }
 0x10b   :  { %2878 = vmatmul.mubr.f32.gmra.mrb[30].mxu0 %v3949_v39 }
 0x1a0   :  { %v2594_v60 = vpop.f32.mrb[0].mxu1 }
 0x1a1   :  { %v926_v9 = vpop.f32.mrb[1].mxu1 }
 0x1a2   :  { %v2834_v20 = vpop.f32.mrb[0].mxu0 }
 0x1a3   :  { %v3072_v27 = vadd.f32 %v2834_v20, %v2594_v60  ;;  %v1872_v12 = vpop.f32.mrb[1].mxu0 }
 0x1a4   :  { %v3073_v3 = vadd.f32 %v1872_v12, %v926_v9  ;;  %v2597_v56 = vpop.f32.mrb[2].mxu1 }
 0x1a5   :  { %2063 = vst [vmem:[#allocation7 + $0x8] sm:$0xff] %v3072_v27  ;;  %v940_v4 = vpop.f32.mrb[3].mxu1 }
 0x1a6   :  { %2062 = vst [vmem:[#allocation7] sm:$0xff] %v3073_v3  ;;  %v2837_v11 = vpop.f32.mrb[2].mxu0 }
 0x1a7   :  { %v3074_v24 = vadd.f32 %v2837_v11, %v2597_v56  ;;  %v1884_v30 = vpop.f32.mrb[3].mxu0 }
 0x1a8   :  { %v3075_v21 = vadd.f32 %v1884_v30, %v940_v4  ;;  %v2600_v23 = vpop.f32.mrb[4].mxu1 }
 0x1a9   :  { %2065 = vst [vmem:[#allocation7 + $0x18] sm:$0xff] %v3074_v24  ;;  %v954_v22 = vpop.f32.mrb[5].mxu1 }
 0x1aa   :  { %2064 = vst [vmem:[#allocation7 + $0x10] sm:$0xff] %v3075_v21  ;;  %v2840_v5 = vpop.f32.mrb[4].mxu0 }
 0x1ab   :  { %v3076_v28 = vadd.f32 %v2840_v5, %v2600_v23  ;;  %v1896_v36 = vpop.f32.mrb[5].mxu0 }
 0x1ac   :  { %v3077_v63 = vadd.f32 %v1896_v36, %v954_v22  ;;  %v2603_v18 = vpop.f32.mrb[6].mxu1 }
 0x1ad   :  { %2067 = vst [vmem:[#allocation7 + $0x28] sm:$0xff] %v3076_v28  ;;  %v968_v57 = vpop.f32.mrb[7].mxu1 }
 0x1ae   :  { %2066 = vst [vmem:[#allocation7 + $0x20] sm:$0xff] %v3077_v63  ;;  %v2843_v29 = vpop.f32.mrb[6].mxu0 }
 0x1af   :  { %v3078_v15 = vadd.f32 %v2843_v29, %v2603_v18  ;;  %v1908_v6 = vpop.f32.mrb[7].mxu0 }
 0x1b0   :  { %v3079_v35 = vadd.f32 %v1908_v6, %v968_v57  ;;  %v2606_v48 = vpop.f32.mrb[8].mxu1 }
 0x1b1   :  { %2069 = vst [vmem:[#allocation7 + $0x38] sm:$0xff] %v3078_v15  ;;  %v982_v37 = vpop.f32.mrb[9].mxu1 }
 0x1b2   :  { %2068 = vst [vmem:[#allocation7 + $0x30] sm:$0xff] %v3079_v35  ;;  %v2846_v39 = vpop.f32.mrb[8].mxu0 }
 0x1b3   :  { %v3080_v49 = vadd.f32 %v2846_v39, %v2606_v48  ;;  %v1920_v59 = vpop.f32.mrb[9].mxu0 }
 0x1b4   :  { %v3081_v2 = vadd.f32 %v1920_v59, %v982_v37  ;;  %v2609_v10 = vpop.f32.mrb[10].mxu1 }
 0x1b5   :  { %2071 = vst [vmem:[#allocation7 + $0x48] sm:$0xff] %v3080_v49  ;;  %v996_v41 = vpop.f32.mrb[11].mxu1 }
 0x1b6   :  { %2070 = vst [vmem:[#allocation7 + $0x40] sm:$0xff] %v3081_v2  ;;  %v2849_v44 = vpop.f32.mrb[10].mxu0 }
 0x1b7   :  { %v3082_v62 = vadd.f32 %v2849_v44, %v2609_v10  ;;  %v1932_v13 = vpop.f32.mrb[11].mxu0 }
 0x1b8   :  { %v3083_v54 = vadd.f32 %v1932_v13, %v996_v41  ;;  %v2612_v61 = vpop.f32.mrb[12].mxu1 }
 0x1b9   :  { %2073 = vst [vmem:[#allocation7 + $0x58] sm:$0xff] %v3082_v62  ;;  %v1010_v38 = vpop.f32.mrb[13].mxu1 }
 0x1ba   :  { %2072 = vst [vmem:[#allocation7 + $0x50] sm:$0xff] %v3083_v54  ;;  %v2852_v52 = vpop.f32.mrb[12].mxu0 }
 0x1bb   :  { %v3084_v58 = vadd.f32 %v2852_v52, %v2612_v61  ;;  %v1944_v26 = vpop.f32.mrb[13].mxu0 }
 0x1bc   :  { %v3085_v51 = vadd.f32 %v1944_v26, %v1010_v38  ;;  %v2615_v32 = vpop.f32.mrb[14].mxu1 }
 0x1bd   :  { %2075 = vst [vmem:[#allocation7 + $0x68] sm:$0xff] %v3084_v58  ;;  %v1024_v14 = vpop.f32.mrb[15].mxu1 }
 0x1be   :  { %2074 = vst [vmem:[#allocation7 + $0x60] sm:$0xff] %v3085_v51  ;;  %v2855_v34 = vpop.f32.mrb[14].mxu0 }
 0x1bf   :  { %v3086_v16 = vadd.f32 %v2855_v34, %v2615_v32  ;;  %v1956_v46 = vpop.f32.mrb[15].mxu0 }
 0x1c0   :  { %v3087_v0 = vadd.f32 %v1956_v46, %v1024_v14  ;;  %v2618_v42 = vpop.f32.mrb[16].mxu1 }
 0x1c1   :  { %2077 = vst [vmem:[#allocation7 + $0x78] sm:$0xff] %v3086_v16  ;;  %v1038_v55 = vpop.f32.mrb[17].mxu1 }
 0x1c2   :  { %2076 = vst [vmem:[#allocation7 + $0x70] sm:$0xff] %v3087_v0  ;;  %v2858_v40 = vpop.f32.mrb[16].mxu0 }
 0x1c3   :  { %v3088_v47 = vadd.f32 %v2858_v40, %v2618_v42  ;;  %v1968_v17 = vpop.f32.mrb[17].mxu0 }
 0x1c4   :  { %v3089_v33 = vadd.f32 %v1968_v17, %v1038_v55  ;;  %v2621_v43 = vpop.f32.mrb[18].mxu1 }
 0x1c5   :  { %2079 = vst [vmem:[#allocation7 + $0x88] sm:$0xff] %v3088_v47  ;;  %v1052_v1 = vpop.f32.mrb[19].mxu1 }
 0x1c6   :  { %2078 = vst [vmem:[#allocation7 + $0x80] sm:$0xff] %v3089_v33  ;;  %v2861_v45 = vpop.f32.mrb[18].mxu0 }
 0x1c7   :  { %v3090_v53 = vadd.f32 %v2861_v45, %v2621_v43  ;;  %v1980_v31 = vpop.f32.mrb[19].mxu0 }
 0x1c8   :  { %v3091_v50 = vadd.f32 %v1980_v31, %v1052_v1  ;;  %v2624_v7 = vpop.f32.mrb[20].mxu1 }
 0x1c9   :  { %2081 = vst [vmem:[#allocation7 + $0x98] sm:$0xff] %v3090_v53  ;;  %v1066_v19 = vpop.f32.mrb[21].mxu1 }
 0x1ca   :  { %2080 = vst [vmem:[#allocation7 + $0x90] sm:$0xff] %v3091_v50  ;;  %v2864_v25 = vpop.f32.mrb[20].mxu0 }
 0x1cb   :  { %v3092_v8 = vadd.f32 %v2864_v25, %v2624_v7  ;;  %v1992_v60 = vpop.f32.mrb[21].mxu0 }
 0x1cc   :  { %v3093_v20 = vadd.f32 %v1992_v60, %v1066_v19  ;;  %v2627_v27 = vpop.f32.mrb[22].mxu1 }
 0x1cd   :  { %2083 = vst [vmem:[#allocation7 + $0xa8] sm:$0xff] %v3092_v8  ;;  %v1080_v3 = vpop.f32.mrb[23].mxu1 }
 0x1ce   :  { %2082 = vst [vmem:[#allocation7 + $0xa0] sm:$0xff] %v3093_v20  ;;  %v2867_v9 = vpop.f32.mrb[22].mxu0 }
 0x1cf   :  { %v3094_v12 = vadd.f32 %v2867_v9, %v2627_v27  ;;  %v2004_v56 = vpop.f32.mrb[23].mxu0 }
 0x1d0   :  { %v3095_v11 = vadd.f32 %v2004_v56, %v1080_v3  ;;  %v2630_v24 = vpop.f32.mrb[24].mxu1 }
 0x1d1   :  { %2085 = vst [vmem:[#allocation7 + $0xb8] sm:$0xff] %v3094_v12  ;;  %v1094_v21 = vpop.f32.mrb[25].mxu1 }
 0x1d2   :  { %2084 = vst [vmem:[#allocation7 + $0xb0] sm:$0xff] %v3095_v11  ;;  %v2870_v4 = vpop.f32.mrb[24].mxu0 }
 0x1d3   :  { %v3096_v30 = vadd.f32 %v2870_v4, %v2630_v24  ;;  %v2016_v23 = vpop.f32.mrb[25].mxu0 }
 0x1d4   :  { %v3097_v5 = vadd.f32 %v2016_v23, %v1094_v21  ;;  %v2633_v28 = vpop.f32.mrb[26].mxu1 }
 0x1d5   :  { %2087 = vst [vmem:[#allocation7 + $0xc8] sm:$0xff] %v3096_v30  ;;  %v1108_v63 = vpop.f32.mrb[27].mxu1 }
 0x1d6   :  { %2086 = vst [vmem:[#allocation7 + $0xc0] sm:$0xff] %v3097_v5  ;;  %v2873_v22 = vpop.f32.mrb[26].mxu0 }
 0x1d7   :  { %v3098_v36 = vadd.f32 %v2873_v22, %v2633_v28  ;;  %v2028_v18 = vpop.f32.mrb[27].mxu0 }
 0x1d8   :  { %v3099_v29 = vadd.f32 %v2028_v18, %v1108_v63  ;;  %v2636_v15 = vpop.f32.mrb[28].mxu1 }
 0x1d9   :  { %2089 = vst [vmem:[#allocation7 + $0xd8] sm:$0xff] %v3098_v36  ;;  %v1122_v35 = vpop.f32.mrb[29].mxu1 }
 0x1da   :  { %2088 = vst [vmem:[#allocation7 + $0xd0] sm:$0xff] %v3099_v29  ;;  %v2876_v57 = vpop.f32.mrb[28].mxu0 }
 0x1db   :  { %v3100_v6 = vadd.f32 %v2876_v57, %v2636_v15  ;;  %v2040_v48 = vpop.f32.mrb[29].mxu0 }
 0x1dc   :  { %v3101_v39 = vadd.f32 %v2040_v48, %v1122_v35  ;;  %v2639_v49 = vpop.f32.mrb[30].mxu1 }
 0x1dd   :  { %2091 = vst [vmem:[#allocation7 + $0xe8] sm:$0xff] %v3100_v6  ;;  %v1136_v2 = vpop.f32.mrb[31].mxu1 }
 0x1de   :  { %2090 = vst [vmem:[#allocation7 + $0xe0] sm:$0xff] %v3101_v39  ;;  %v2879_v37 = vpop.f32.mrb[30].mxu0 }
 0x1df   :  { %v3102_v59 = vadd.f32 %v2879_v37, %v2639_v49  ;;  %v2052_v10 = vpop.f32.mrb[31].mxu0 }
 0x1e0   :  { %v3103_v44 = vadd.f32 %v2052_v10, %v1136_v2 }
 0x1e1   :  { %2093 = vst [vmem:[#allocation7 + $0xf8] sm:$0xff] %v3102_v59 }
 0x1e2   :  { %2092 = vst [vmem:[#allocation7 + $0xf0] sm:$0xff] %v3103_v44 }
 0x1e3   :  { %3292 = shalt.err (!%p3289_p6)
}
 0x1e4   :  { %s3293_s10 = scalar_lea.hbm %s4144_s2, 4096 }
 0x1e5   :  { %p3294_p7 = scmp.ne.s32.totalorder %s4144_s2, %s3293_s10  ;;  %p3297_p8 = scmp.lt.u32.totalorder %s3293_s10, %s4144_s2 }
 0x1e7   :  { %p3299_p9 = pnand %p3297_p8, %p3294_p7 }
 0x1e9   :  { %3302 = shalt.err (!%p3299_p9)
}
 0x1ea   :  { %2105 = dma.vmem_to_hbm [thread:$0]  %s2100_s6, 4096, %s4144_s2, [#allocation4], %s3310_s19, %s3310_s19, %s3311_s20  }
 0x1eb   :  { %3307 = dma.done.wait [#allocation4], 4096  }
 0x1ec   :  { %3308 = vsyncadd [#allocation4], 4294963200 }
 0x1ed   :  { %2109 = vsyncpa [#allocation3], 1 }
 0x1ee   :  { %2110 = vsyncpa [#allocation6], 1 }
 0x1ef   :  { %2111 = vsyncpa [#allocation4], 1 }

</bundles_post_ra>
